<compile_context>
chip_gen: v7x
topology: tpu7x:2x2x1
jax: 0.10.0
libtpu: 0.0.40
codegen_flags: <defaults>
</compile_context>

<pallas_src>
import functools
import math

import jax
import jax.numpy as jnp
from jax.experimental import pallas as pl
from jax.experimental.pallas import tpu as pltpu


def _round_up(x, m):
    return (x + m - 1) // m * m


# ----------------------------- fused FFN kernel -----------------------------

def _ffn_fused_kernel(x_ref, w1_ref, b1_ref, w2_ref, b2_ref, o_ref, h_ref,
                      *, cast_bf16):
    # Block shapes: x (tm, D), w1 (D, d_ff), b1 (1, d_ff), w2 (d_ff, N),
    #               b2 (1, N), o (tm, N), scratch h (tm, d_ff).
    x = x_ref[...]
    w1 = w1_ref[...]
    if cast_bf16:
        x = x.astype(jnp.bfloat16)
        w1 = w1.astype(jnp.bfloat16)
    # First matmul on the MXU with f32 accumulation; bias + ReLU in f32 (VPU).
    h = jnp.dot(x, w1, preferred_element_type=jnp.float32)
    h = jnp.maximum(h + b1_ref[...].astype(jnp.float32), 0.0)
    # Keep the (tm, d_ff) intermediate resident in VMEM scratch (never in HBM).
    h_ref[...] = h.astype(h_ref.dtype)

    h2 = h_ref[...]
    w2 = w2_ref[...]
    if cast_bf16:
        w2 = w2.astype(jnp.bfloat16)
    o = jnp.dot(h2, w2, preferred_element_type=jnp.float32)
    o_ref[...] = (o + b2_ref[...].astype(jnp.float32)).astype(o_ref.dtype)


def pallas_positionwise_ffn_2d(x2d, w1, b1, w2, b2, *, tm=512,
                               use_bf16_matmul=False):
    """x2d: (M, d_model) f32 -> (M, d_model) f32, fused W1+ReLU+W2 in one call."""
    M, D = x2d.shape
    d_ff = w1.shape[1]
    N = w2.shape[1]

    # Largest row tile that does not exceed the (sublane-rounded) problem size.
    tm = max(8, min(tm, _round_up(M, 8)))
    Mp = _round_up(M, tm)
    if Mp != M:
        x2d = jnp.pad(x2d, ((0, Mp - M), (0, 0)))

    scratch_dtype = jnp.bfloat16 if use_bf16_matmul else jnp.float32
    kernel = functools.partial(_ffn_fused_kernel, cast_bf16=use_bf16_matmul)

    out = pl.pallas_call(
        kernel,
        out_shape=jax.ShapeDtypeStruct((Mp, N), x2d.dtype),
        grid=(Mp // tm,),
        in_specs=[
            pl.BlockSpec((tm, D), lambda i: (i, 0)),        # activations (tiled)
            pl.BlockSpec((D, d_ff), lambda i: (0, 0)),      # W1 (resident)
            pl.BlockSpec((1, d_ff), lambda i: (0, 0)),      # b1
            pl.BlockSpec((d_ff, N), lambda i: (0, 0)),      # W2 (resident)
            pl.BlockSpec((1, N), lambda i: (0, 0)),         # b2
        ],
        out_specs=pl.BlockSpec((tm, N), lambda i: (i, 0)),
        scratch_shapes=[pltpu.VMEM((tm, d_ff), scratch_dtype)],
        compiler_params=pltpu.CompilerParams(
            dimension_semantics=("parallel",),              # megacore on v7x
            vmem_limit_bytes=64 * 1024 * 1024,              # fits v7x 64 MiB VMEM
        ),
    )(x2d, w1, b1.reshape(1, d_ff), w2, b2.reshape(1, N))
    return out[:M]


def positionwise_feedforward(x, w1, b1, w2, b2, *, tm=512, use_bf16_matmul=False):
    """Matches PyTorch PositionwiseFeedforward.forward (eval mode, dropout = id).

    x: (..., d_model) f32. Linear weights stored as (in, out) so y = x @ W + b.
    """
    lead = x.shape[:-1]
    D = x.shape[-1]
    x2d = x.reshape(-1, D)
    y2d = pallas_positionwise_ffn_2d(x2d, w1, b1, w2, b2, tm=tm,
                                     use_bf16_matmul=use_bf16_matmul)
    return y2d.reshape(*lead, w2.shape[1])


# ----------------------------- main -----------------------------

if __name__ == "__main__":
    # Small, lane-dense demo shapes: batch=2, seq=8, d_model=128, d_ff=256.
    B, S, D_MODEL, D_FF = 2, 8, 128, 256

    key = jax.random.PRNGKey(0)
    kx, kw1, kb1, kw2, kb2 = jax.random.split(key, 5)
    x = jax.random.normal(kx, (B, S, D_MODEL), jnp.float32)
    w1 = 0.02 * jax.random.normal(kw1, (D_MODEL, D_FF), jnp.float32)
    b1 = 0.01 * jax.random.normal(kb1, (D_FF,), jnp.float32)
    w2 = 0.02 * jax.random.normal(kw2, (D_FF, D_MODEL), jnp.float32)
    b2 = 0.01 * jax.random.normal(kb2, (D_MODEL,), jnp.float32)

    # f32 path: exact-semantics match with the PyTorch reference.
    fwd_f32 = jax.jit(functools.partial(positionwise_feedforward,
                                        use_bf16_matmul=False))
    out = fwd_f32(x, w1, b1, w2, b2)
    jax.block_until_ready(out)

    ref = jnp.maximum(x @ w1 + b1, 0.0) @ w2 + b2
    assert out.shape == (B, S, D_MODEL) and out.dtype == jnp.float32
    assert jnp.allclose(out, ref, atol=1e-4, rtol=1e-4), "f32 fused FFN mismatch"

    # bf16-operand path (v6e/v7x MXU peak; f32 accumulation + f32 epilogue).
    fwd_bf16 = jax.jit(functools.partial(positionwise_feedforward,
                                         use_bf16_matmul=True))
    out_bf16 = fwd_bf16(x, w1, b1, w2, b2)
    jax.block_until_ready(out_bf16)
    assert jnp.allclose(out_bf16, ref, atol=5e-2, rtol=5e-2), "bf16 fused FFN mismatch"

    print("KERNEL_OK")
</pallas_src>

<mosaic_0001>
module attributes {stable_mosaic.version = 11 : i64} {
  func.func @_ffn_fused_kernel(%arg0: i32, %arg1: memref<16x128xf32, #tpu.memory_space<vmem>>, %arg2: memref<128x256xf32, #tpu.memory_space<vmem>>, %arg3: memref<1x256xf32, #tpu.memory_space<vmem>>, %arg4: memref<256x128xf32, #tpu.memory_space<vmem>>, %arg5: memref<1x128xf32, #tpu.memory_space<vmem>>, %arg6: memref<16x128xf32, #tpu.memory_space<vmem>>, %arg7: memref<16x256xf32, #tpu.memory_space<vmem>>) attributes {dimension_semantics = [#tpu.dimension_semantics<parallel>], iteration_bounds = array<i64: 1>, scalar_prefetch = 0 : i64, scratch_operands = 1 : i64, tpu.core_type = #tpu.core_type<tc>, window_params = [{transform_indices = @transform_0, window_bounds = array<i64: 16, 128>}, {pipeline_mode = #tpu.pipeline_mode<synchronous>, transform_indices = @transform_1, window_bounds = array<i64: 128, 256>}, {pipeline_mode = #tpu.pipeline_mode<synchronous>, transform_indices = @transform_2, window_bounds = array<i64: 1, 256>}, {pipeline_mode = #tpu.pipeline_mode<synchronous>, transform_indices = @transform_3, window_bounds = array<i64: 256, 128>}, {pipeline_mode = #tpu.pipeline_mode<synchronous>, transform_indices = @transform_4, window_bounds = array<i64: 1, 128>}, {transform_indices = @transform_5, window_bounds = array<i64: 16, 128>}]} {
    %c0 = arith.constant 0 : index
    %c0_0 = arith.constant 0 : index
    %0 = vector.load %arg1[%c0, %c0_0] : memref<16x128xf32, #tpu.memory_space<vmem>>, vector<16x128xf32>
    %c0_1 = arith.constant 0 : index
    %c0_2 = arith.constant 0 : index
    %1 = vector.load %arg2[%c0_1, %c0_2] : memref<128x256xf32, #tpu.memory_space<vmem>>, vector<128x256xf32>
    %cst = arith.constant dense<0.000000e+00> : vector<16x256xf32>
    %2 = tpu.matmul %0, %1, %cst {dimension_numbers = #tpu.dot_dimension_numbers<[1], [0], [0], [1], [0, 0, 1, 1], [], []>} : vector<16x128xf32>, vector<128x256xf32>, vector<16x256xf32> -> vector<16x256xf32>
    %c0_3 = arith.constant 0 : index
    %c0_4 = arith.constant 0 : index
    %3 = vector.load %arg3[%c0_3, %c0_4] : memref<1x256xf32, #tpu.memory_space<vmem>>, vector<1x256xf32>
    %4 = vector.broadcast %3 : vector<1x256xf32> to vector<16x256xf32>
    %5 = arith.addf %2, %4 : vector<16x256xf32>
    %cst_5 = arith.constant 0.000000e+00 : f32
    %6 = vector.broadcast %cst_5 : f32 to vector<16x256xf32>
    %7 = arith.maximumf %5, %6 : vector<16x256xf32>
    %c0_6 = arith.constant 0 : index
    %c0_7 = arith.constant 0 : index
    %8 = vector.load %arg7[%c0_6, %c0_7] : memref<16x256xf32, #tpu.memory_space<vmem>>, vector<16x256xf32>
    tpu.vector_store %arg7[%c0_6, %c0_7], %7 {strides = array<i32>} : memref<16x256xf32, #tpu.memory_space<vmem>>, vector<16x256xf32>,
    %c0_8 = arith.constant 0 : index
    %c0_9 = arith.constant 0 : index
    %9 = vector.load %arg7[%c0_8, %c0_9] : memref<16x256xf32, #tpu.memory_space<vmem>>, vector<16x256xf32>
    %c0_10 = arith.constant 0 : index
    %c0_11 = arith.constant 0 : index
    %10 = vector.load %arg4[%c0_10, %c0_11] : memref<256x128xf32, #tpu.memory_space<vmem>>, vector<256x128xf32>
    %cst_12 = arith.constant dense<0.000000e+00> : vector<16x128xf32>
    %11 = tpu.matmul %9, %10, %cst_12 {dimension_numbers = #tpu.dot_dimension_numbers<[1], [0], [0], [1], [0, 0, 1, 1], [], []>} : vector<16x256xf32>, vector<256x128xf32>, vector<16x128xf32> -> vector<16x128xf32>
    %c0_13 = arith.constant 0 : index
    %c0_14 = arith.constant 0 : index
    %12 = vector.load %arg5[%c0_13, %c0_14] : memref<1x128xf32, #tpu.memory_space<vmem>>, vector<1x128xf32>
    %13 = vector.broadcast %12 : vector<1x128xf32> to vector<16x128xf32>
    %14 = arith.addf %11, %13 : vector<16x128xf32>
    %c0_15 = arith.constant 0 : index
    %c0_16 = arith.constant 0 : index
    %15 = vector.load %arg6[%c0_15, %c0_16] : memref<16x128xf32, #tpu.memory_space<vmem>>, vector<16x128xf32>
    tpu.vector_store %arg6[%c0_15, %c0_16], %14 {strides = array<i32>} : memref<16x128xf32, #tpu.memory_space<vmem>>, vector<16x128xf32>,
    return
  }
  func.func @transform_0(%arg0: i32) -> (i32, i32) {
    %c0_i32 = arith.constant 0 : i32
    %c0_i32_0 = arith.constant 0 : i32
    return %arg0, %c0_i32 : i32, i32
  }
  func.func @transform_1(%arg0: i32) -> (i32, i32) {
    %c0_i32 = arith.constant 0 : i32
    %c0_i32_0 = arith.constant 0 : i32
    %c0_i32_1 = arith.constant 0 : i32
    return %c0_i32, %c0_i32_0 : i32, i32
  }
  func.func @transform_2(%arg0: i32) -> (i32, i32) {
    %c0_i32 = arith.constant 0 : i32
    %c0_i32_0 = arith.constant 0 : i32
    %c0_i32_1 = arith.constant 0 : i32
    return %c0_i32, %c0_i32_0 : i32, i32
  }
  func.func @transform_3(%arg0: i32) -> (i32, i32) {
    %c0_i32 = arith.constant 0 : i32
    %c0_i32_0 = arith.constant 0 : i32
    %c0_i32_1 = arith.constant 0 : i32
    return %c0_i32, %c0_i32_0 : i32, i32
  }
  func.func @transform_4(%arg0: i32) -> (i32, i32) {
    %c0_i32 = arith.constant 0 : i32
    %c0_i32_0 = arith.constant 0 : i32
    %c0_i32_1 = arith.constant 0 : i32
    return %c0_i32, %c0_i32_0 : i32, i32
  }
  func.func @transform_5(%arg0: i32) -> (i32, i32) {
    %c0_i32 = arith.constant 0 : i32
    %c0_i32_0 = arith.constant 0 : i32
    return %arg0, %c0_i32 : i32, i32
  }
}

</mosaic_0001>

<bundles_post_ra>
// kernel: positionwise_feedforward.1
= control target key start
LH: loop header
LB: loop body
LE: loop exit
PB: predicated region body
PF: predicated region fallthrough
CT: control target
= control target key end

     0   :  { %10 = vsyncpa [#allocation4], 0  ;;  %s733_s0 = inlined_call_operand.hbm [shape: f32[16,128], index: 0, kind: input, shape index: {}]   ;;  %s734_s1 = inlined_call_operand.hbm [shape: f32[128,256], index: 1, kind: input, shape index: {}]   ;;  %s735_s2 = inlined_call_operand.hbm [shape: f32[1,256], index: 2, kind: input, shape index: {}]   ;;  %s736_s3 = inlined_call_operand.hbm [shape: f32[256,128], index: 3, kind: input, shape index: {}]   ;;  %s737_s4 = inlined_call_operand.hbm [shape: f32[1,128], index: 4, kind: input, shape index: {}]   ;;  %s738_s5 = inlined_call_operand.hbm [shape: f32[16,128], index: 5, kind: output, shape index: {}]  }
   0x1   :  { %11 = vsyncpa [#allocation7], 0 }
   0x2   :  { %12 = vsyncpa [#allocation10], 0 }
   0x3   :  { %13 = vsyncpa [#allocation5], 0  ;;  %s609_s18 = smov [#allocation6]   ;;  %s469_s22 = scalar_lea.hbm %s734_s1, 4096 }
   0x4   :  { %s31_s19 = sshll.u32 %s609_s18, 4  ;;  %p470_p0 = scmp.ne.s32.totalorder %s734_s1, %s469_s22  ;;  %s32_s19 = int_to_ptr.vmem [resolvable:$true] %s31_s19 }
   0x5   :  { %p473_p1 = scmp.lt.u32.totalorder %s469_s22, %s734_s1 }
   0x7   :  { %p475_p2 = pnand %p473_p1, %p470_p0 }
   0x9   :  { %478 = shalt.err (!%p475_p2)
}
   0xa   :  { %s479_s27 = scalar_lea.vmem %s32_s19, 4096  ;;  %p484_p4 = scmp.lt.s32.totalorder %s32_s19, %s32_s19 }
   0xb   :  { %p480_p3 = scmp.ne.s32.totalorder %s32_s19, %s479_s27  ;;  %p485_p5 = scmp.lt.s32.totalorder %s479_s27, %s479_s27 }
   0xd   :  { %p486_p6 = por %p485_p5, %p484_p4 }
   0xf   :  { %p487_p7 = pnand %p486_p6, %p480_p3 }
  0x11   :  { %490 = shalt.err (!%p487_p7)
}
  0x12   :  { %s610_s28 = smov 256   ;;  %s611_s29 = smov 16  }
  0x13   :  { %37 = dma.hbm_to_vmem [thread:$0]  %s734_s1, 4096, %s32_s19, [#allocation7], %s610_s28, %s610_s28, %s611_s29  }
  0x14   :  { %s612_s7 = smov [#allocation9]   ;;  %s613_s9 = smov [#allocation3]  }
  0x15   :  { %s53_s8 = sshll.u32 %s612_s7, 4  ;;  %s19_s10 = sshll.u32 %s613_s9, 4  ;;  %s54_s8 = int_to_ptr.vmem [resolvable:$true] %s53_s8  ;;  %s20_s10 = int_to_ptr.vmem [resolvable:$true] %s19_s10 }
  0x16   :  { %s491_s13 = scalar_lea.hbm %s736_s3, 4096 }
  0x17   :  { %p492_p8 = scmp.ne.s32.totalorder %s736_s3, %s491_s13  ;;  %p495_p9 = scmp.lt.u32.totalorder %s491_s13, %s736_s3 }
  0x19   :  { %p497_p10 = pnand %p495_p9, %p492_p8 }
  0x1b   :  { %500 = shalt.err (!%p497_p10)
}
  0x1c   :  { %s501_s1 = scalar_lea.vmem %s54_s8, 4096  ;;  %p506_p12 = scmp.lt.s32.totalorder %s54_s8, %s54_s8 }
  0x1d   :  { %p502_p11 = scmp.ne.s32.totalorder %s54_s8, %s501_s1  ;;  %p507_p13 = scmp.lt.s32.totalorder %s501_s1, %s501_s1 }
  0x1f   :  { %p508_p0 = por %p507_p13, %p506_p12 }
  0x21   :  { %p509_p1 = pnand %p508_p0, %p502_p11 }
  0x23   :  { %512 = shalt.err (!%p509_p1)
}
  0x24   :  { %s614_s18 = smov 128   ;;  %s615_s19 = smov 8  }
  0x25   :  { %59 = dma.hbm_to_vmem [thread:$0]  %s736_s3, 4096, %s54_s8, [#allocation10], %s614_s18, %s614_s18, %s615_s19  }
  0x26   :  { %s513_s24 = scalar_lea.hbm %s733_s0, 256 }
  0x27   :  { %p514_p2 = scmp.ne.s32.totalorder %s733_s0, %s513_s24  ;;  %p517_p3 = scmp.lt.u32.totalorder %s513_s24, %s733_s0 }
  0x29   :  { %p519_p4 = pnand %p517_p3, %p514_p2 }
  0x2b   :  { %522 = shalt.err (!%p519_p4)
}
  0x2c   :  { %s523_s29 = scalar_lea.vmem %s20_s10, 256  ;;  %p528_p6 = scmp.lt.s32.totalorder %s20_s10, %s20_s10 }
  0x2d   :  { %p524_p5 = scmp.ne.s32.totalorder %s20_s10, %s523_s29  ;;  %p529_p7 = scmp.lt.s32.totalorder %s523_s29, %s523_s29 }
  0x2f   :  { %p530_p8 = por %p529_p7, %p528_p6 }
  0x31   :  { %p531_p9 = pnand %p530_p8, %p524_p5 }
  0x33   :  { %534 = shalt.err (!%p531_p9)
}
  0x34   :  { %25 = dma.hbm_to_vmem [thread:$0]  %s733_s0, 256, %s20_s10, [#allocation4], %s614_s18, %s614_s18, %s615_s19  }
  0x35   :  { %s616_s6 = smov [#allocation8]   ;;  %s617_s8 = smov [#allocation11]  }
  0x36   :  { %s44_s7 = sshll.u32 %s616_s6, 4  ;;  %s66_s9 = sshll.u32 %s617_s8, 4  ;;  %s45_s7 = int_to_ptr.vmem [resolvable:$true] %s44_s7  ;;  %s67_s9 = int_to_ptr.vmem [resolvable:$true] %s66_s9 }
  0x37   :  { %s535_s13 = scalar_lea.hbm %s735_s2, 32 }
  0x38   :  { %p536_p10 = scmp.ne.s32.totalorder %s735_s2, %s535_s13  ;;  %p539_p11 = scmp.lt.u32.totalorder %s535_s13, %s735_s2 }
  0x3a   :  { %p541_p12 = pnand %p539_p11, %p536_p10 }
  0x3c   :  { %544 = shalt.err (!%p541_p12)
}
  0x3d   :  { %s545_s0 = scalar_lea.vmem %s45_s7, 32  ;;  %p550_p0 = scmp.lt.s32.totalorder %s45_s7, %s45_s7 }
  0x3e   :  { %p546_p13 = scmp.ne.s32.totalorder %s45_s7, %s545_s0  ;;  %p551_p1 = scmp.lt.s32.totalorder %s545_s0, %s545_s0 }
  0x40   :  { %p552_p2 = por %p551_p1, %p550_p0 }
  0x42   :  { %p553_p3 = pnand %p552_p2, %p546_p13 }
  0x44   :  { %556 = shalt.err (!%p553_p3)
}
  0x45   :  { %47 = dma.hbm_to_vmem [thread:$0]  %s735_s2, 32, %s45_s7, [#allocation7]  }
  0x46   :  { %s557_s22 = scalar_lea.hbm %s737_s4, 16 }
  0x47   :  { %p558_p4 = scmp.ne.s32.totalorder %s737_s4, %s557_s22  ;;  %p561_p5 = scmp.lt.u32.totalorder %s557_s22, %s737_s4 }
  0x49   :  { %p563_p6 = pnand %p561_p5, %p558_p4 }
  0x4b   :  { %566 = shalt.err (!%p563_p6)
}
  0x4c   :  { %s567_s27 = scalar_lea.vmem %s67_s9, 16  ;;  %s571_s28 = scalar_lea.vmem %s67_s9, 32 }
  0x4d   :  { %p568_p7 = scmp.ne.s32.totalorder %s67_s9, %s567_s27  ;;  %p572_p8 = scmp.lt.s32.totalorder %s67_s9, %s67_s9 }
  0x4e   :  { %p573_p9 = scmp.lt.s32.totalorder %s571_s28, %s567_s27 }
  0x50   :  { %p574_p10 = por %p573_p9, %p572_p8 }
  0x52   :  { %p575_p11 = pnand %p574_p10, %p568_p7 }
  0x54   :  { %578 = shalt.err (!%p575_p11)
}
  0x55   :  { %69 = dma.hbm_to_vmem [thread:$0]  %s737_s4, 16, %s67_s9, [#allocation10]  }
  0x56   :  { %601 = dma.done.wait [#allocation4], 256  }
  0x57   :  { %602 = vsyncadd [#allocation4], 4294967040 }
  0x58   :  { %603 = dma.done.wait [#allocation7], 4128  }
  0x59   :  { %604 = vsyncadd [#allocation7], 4294963168 }
  0x5a   :  { %605 = dma.done.wait [#allocation10], 4112  }
  0x5b   :  { %606 = vsyncadd [#allocation10], 4294963184  ;;  %v618_v0 = vmov 0.0   ;;  %v88_v1 = vld [vmem:[#allocation6 + $0x8] sm:$0xff]  ;;  %v90_v2 = vld [vmem:[#allocation6 + $0x18] sm:$0xff]  ;;  %s619_s4 = smov [#allocation12]  }
  0x5c   :  { %195 = vmatprep.mubr.f32.mxu0 %v618_v0  ;;  %v87_v3 = vld [vmem:[#allocation6] sm:$0xff]  ;;  %v394_v4 = vpack.c.bf16 %v90_v2, %v88_v1  ;;  %v89_v5 = vld [vmem:[#allocation6 + $0x10] sm:$0xff]  ;;  %v92_v6 = vld [vmem:[#allocation6 + $0x28] sm:$0xff]  ;;  %s341_s3 = sshll.u32 %s619_s4, 4  ;;  %s342_s3 = int_to_ptr.vmem [resolvable:$true] %s341_s3 }
  0x5d   :  { %v94_v7 = vld [vmem:[#allocation6 + $0x38] sm:$0xff]  ;;  %v396_v8 = vpack.c.bf16 %v89_v5, %v87_v3  ;;  %v91_v10 = vld [vmem:[#allocation6 + $0x20] sm:$0xff]  ;;  %v93_v11 = vld [vmem:[#allocation6 + $0x30] sm:$0xff]  ;;  %s579_s30 = scalar_lea.vmem %s342_s3, 256  ;;  %p584_p13 = scmp.lt.s32.totalorder %s342_s3, %s342_s3 }
  0x5e   :  { %v398_v9 = vpack.c.bf16 %v94_v7, %v92_v6  ;;  %v96_v12 = vld [vmem:[#allocation6 + $0x48] sm:$0xff]  ;;  %395 = vmatprep.subr.bf16.mxu0 %v394_v4  ;;  %v98_v13 = vld [vmem:[#allocation6 + $0x58] sm:$0xff]  ;;  %v400_v14 = vpack.c.bf16 %v93_v11, %v91_v10  ;;  %v95_v16 = vld [vmem:[#allocation6 + $0x40] sm:$0xff]  ;;  %p580_p12 = scmp.ne.s32.totalorder %s342_s3, %s579_s30  ;;  %p585_p0 = scmp.lt.s32.totalorder %s579_s30, %s579_s30 }
  0x5f   :  { %397 = vmatpush1.bf16.msra.mxu0 %v396_v8  ;;  %v402_v15 = vpack.c.bf16 %v98_v13, %v96_v12  ;;  %v97_v17 = vld [vmem:[#allocation6 + $0x50] sm:$0xff]  ;;  %v100_v18 = vld [vmem:[#allocation6 + $0x68] sm:$0xff]  ;;  %v102_v19 = vld [vmem:[#allocation6 + $0x78] sm:$0xff] }
  0x60   :  { %399 = vmatprep.subr.bf16.mxu0 %v398_v9  ;;  %v404_v20 = vpack.c.bf16 %v97_v17, %v95_v16  ;;  %v406_v21 = vpack.c.bf16 %v102_v19, %v100_v18  ;;  %v99_v22 = vld [vmem:[#allocation6 + $0x60] sm:$0xff]  ;;  %v101_v23 = vld [vmem:[#allocation6 + $0x70] sm:$0xff]  ;;  %v104_v24 = vld [vmem:[#allocation6 + $0x88] sm:$0xff]  ;;  %p586_p1 = por %p585_p0, %p584_p13 }
  0x61   :  { %v106_v25 = vld [vmem:[#allocation6 + $0x98] sm:$0xff]  ;;  %v103_v26 = vld [vmem:[#allocation6 + $0x80] sm:$0xff]  ;;  %v105_v27 = vld [vmem:[#allocation6 + $0x90] sm:$0xff]  ;;  %v408_v30 = vpack.c.bf16 %v101_v23, %v99_v22 }
  0x62   :  { %v236_v28 = vld [vmem:[#allocation9 + $0x80] sm:$0xff]  ;;  %v237_v29 = vld [vmem:[#allocation9 + $0x88] sm:$0xff]  ;;  %v238_v35 = vld [vmem:[#allocation9 + $0x90] sm:$0xff]  ;;  %v410_v36 = vpack.c.bf16 %v106_v25, %v104_v24  ;;  %v412_v46 = vpack.c.bf16 %v105_v27, %v103_v26  ;;  %p587_p2 = pnand %p586_p1, %p580_p12 }
  0x63   :  { %401 = vmatpush1.bf16.msra.mxu0 %v400_v14  ;;  %v108_v31 = vld [vmem:[#allocation6 + $0xa8] sm:$0xff]  ;;  %v426_v32 = vpack.c.bf16 %v237_v29, %v236_v28  ;;  %v239_v38 = vld [vmem:[#allocation9 + $0x98] sm:$0xff]  ;;  %v222_v39 = vld [vmem:[#allocation9 + $0x10] sm:$0xff] }
  0x64   :  { %403 = vmatprep.subr.bf16.mxu0 %v402_v15  ;;  %v220_v33 = vld [vmem:[#allocation9] sm:$0xff]  ;;  %v221_v34 = vld [vmem:[#allocation9 + $0x8] sm:$0xff]  ;;  %v223_v40 = vld [vmem:[#allocation9 + $0x18] sm:$0xff]  ;;  %v430_v42 = vpack.c.bf16 %v239_v38, %v238_v35 }
  0x65   :  { %v428_v37 = vpack.c.bf16 %v221_v34, %v220_v33  ;;  %v110_v41 = vld [vmem:[#allocation6 + $0xb8] sm:$0xff]  ;;  %427 = vmatprep.subr.bf16.mxu1 %v426_v32  ;;  %v240_v43 = vld [vmem:[#allocation9 + $0xa0] sm:$0xff]  ;;  %v241_v44 = vld [vmem:[#allocation9 + $0xa8] sm:$0xff]  ;;  %v432_v45 = vpack.c.bf16 %v223_v40, %v222_v39 }
  0x66   :  { %v107_v47 = vld [vmem:[#allocation6 + $0xa0] sm:$0xff]  ;;  %v434_v48 = vpack.c.bf16 %v241_v44, %v240_v43  ;;  %v225_v50 = vld [vmem:[#allocation9 + $0x28] sm:$0xff]  ;;  %v414_v51 = vpack.c.bf16 %v110_v41, %v108_v31  ;;  %v242_v53 = vld [vmem:[#allocation9 + $0xb0] sm:$0xff] }
  0x67   :  { %405 = vmatpush1.bf16.msra.mxu0 %v404_v20  ;;  %429 = vmatpush3.bf16.msra.mxu1 %v428_v37  ;;  %v224_v49 = vld [vmem:[#allocation9 + $0x20] sm:$0xff]  ;;  %v109_v52 = vld [vmem:[#allocation6 + $0xb0] sm:$0xff]  ;;  %v243_v54 = vld [vmem:[#allocation9 + $0xb8] sm:$0xff] }
  0x68   :  { %407 = vmatprep.subr.bf16.mxu0 %v406_v21  ;;  %431 = vmatprep.subr.bf16.mxu1 %v430_v42  ;;  %v112_v55 = vld [vmem:[#allocation6 + $0xc8] sm:$0xff]  ;;  %v114_v56 = vld [vmem:[#allocation6 + $0xd8] sm:$0xff]  ;;  %v436_v57 = vpack.c.bf16 %v225_v50, %v224_v49  ;;  %v416_v58 = vpack.c.bf16 %v109_v52, %v107_v47  ;;  %v111_v59 = vld [vmem:[#allocation6 + $0xc0] sm:$0xff]  ;;  %v438_v60 = vpack.c.bf16 %v243_v54, %v242_v53 }
  0x69   :  { %v226_v61 = vld [vmem:[#allocation9 + $0x30] sm:$0xff]  ;;  %v227_v62 = vld [vmem:[#allocation9 + $0x38] sm:$0xff]  ;;  %v418_v63 = vpack.c.bf16 %v114_v56, %v112_v55  ;;  %v244_v2 = vld [vmem:[#allocation9 + $0xc0] sm:$0xff] }
  0x6a   :  { %v113_v1 = vld [vmem:[#allocation6 + $0xd0] sm:$0xff]  ;;  %v116_v4 = vld [vmem:[#allocation6 + $0xe8] sm:$0xff]  ;;  %v118_v5 = vld [vmem:[#allocation6 + $0xf8] sm:$0xff]  ;;  %v440_v6 = vpack.c.bf16 %v227_v62, %v226_v61 }
  0x6b   :  { %409 = vmatpush1.bf16.msra.mxu0 %v408_v30  ;;  %433 = vmatpush3.bf16.msra.mxu1 %v432_v45  ;;  %v245_v3 = vld [vmem:[#allocation9 + $0xc8] sm:$0xff]  ;;  %v420_v7 = vpack.c.bf16 %v113_v1, %v111_v59  ;;  %v115_v8 = vld [vmem:[#allocation6 + $0xe0] sm:$0xff]  ;;  %v422_v12 = vpack.c.bf16 %v118_v5, %v116_v4  ;;  %v246_v14 = vld [vmem:[#allocation9 + $0xd0] sm:$0xff] }
  0x6c   :  { %411 = vmatprep.subr.bf16.mxu0 %v410_v36  ;;  %435 = vmatprep.subr.bf16.mxu1 %v434_v48  ;;  %v442_v9 = vpack.c.bf16 %v245_v3, %v244_v2  ;;  %v228_v10 = vld [vmem:[#allocation9 + $0x40] sm:$0xff]  ;;  %v229_v11 = vld [vmem:[#allocation9 + $0x48] sm:$0xff]  ;;  %v247_v15 = vld [vmem:[#allocation9 + $0xd8] sm:$0xff]  ;;  %v121_v36 = vlaneseq }
  0x6d   :  { %v117_v13 = vld [vmem:[#allocation6 + $0xf0] sm:$0xff]  ;;  %v444_v16 = vpack.c.bf16 %v229_v11, %v228_v10  ;;  %v446_v18 = vpack.c.bf16 %v247_v15, %v246_v14  ;;  %v231_v20 = vld [vmem:[#allocation9 + $0x58] sm:$0xff]  ;;  %v248_v21 = vld [vmem:[#allocation9 + $0xe0] sm:$0xff] }
  0x6e   :  { %v424_v17 = vpack.c.bf16 %v117_v13, %v115_v8  ;;  %v230_v19 = vld [vmem:[#allocation9 + $0x50] sm:$0xff]  ;;  %v249_v22 = vld [vmem:[#allocation9 + $0xe8] sm:$0xff]  ;;  %v232_v27 = vld [vmem:[#allocation9 + $0x60] sm:$0xff]  ;;  %v122_v37 = vshrl.u32 %v121_v36, 7 }
  0x6f   :  { %413 = vmatpush1.bf16.msra.mxu0 %v412_v46  ;;  %437 = vmatpush3.bf16.msra.mxu1 %v436_v57  ;;  %v448_v23 = vpack.c.bf16 %v231_v20, %v230_v19  ;;  %v85_v24 = vld [vmem:[#allocation3] sm:$0xff]  ;;  %v450_v25 = vpack.c.bf16 %v249_v22, %v248_v21  ;;  %v86_v26 = vld [vmem:[#allocation3 + $0x8] sm:$0xff]  ;;  %v119_v39 = vld [vmem:[#allocation8] sm:$0x3] }
  0x70   :  { %415 = vmatprep.subr.bf16.mxu0 %v414_v51  ;;  %439 = vmatprep.subr.bf16.mxu1 %v438_v60  ;;  %v233_v28 = vld [vmem:[#allocation9 + $0x68] sm:$0xff]  ;;  %v250_v30 = vld [vmem:[#allocation9 + $0xf0] sm:$0xff]  ;;  %v251_v31 = vld [vmem:[#allocation9 + $0xf8] sm:$0xff]  ;;  %v123_v38 = vsub.s32 0, %v122_v37 }
  0x71   :  { %v452_v29 = vpack.c.bf16 %v233_v28, %v232_v27  ;;  %v454_v32 = vpack.c.bf16 %v251_v31, %v250_v30  ;;  %v234_v33 = vld [vmem:[#allocation9 + $0x70] sm:$0xff]  ;;  %v235_v34 = vld [vmem:[#allocation9 + $0x78] sm:$0xff]  ;;  %v355_v55 = vld [vmem:[#allocation11] ss:$0 sm:$0xff] }
  0x72   :  { %v456_v35 = vpack.c.bf16 %v235_v34, %v234_v33  ;;  %v124_v40 = vrot.slane %v119_v39, %v123_v38 }
  0x73   :  { %417 = vmatpush1.bf16.msra.mxu0 %v416_v58  ;;  %441 = vmatpush3.bf16.msra.mxu1 %v440_v6 }
  0x74   :  { %419 = vmatprep.subr.bf16.mxu0 %v418_v63  ;;  %443 = vmatprep.subr.bf16.mxu1 %v442_v9 }
  0x77   :  { %421 = vmatpush1.bf16.msra.mxu0 %v420_v7  ;;  %445 = vmatpush3.bf16.msra.mxu1 %v444_v16 }
  0x78   :  { %423 = vmatprep.subr.bf16.mxu0 %v422_v12  ;;  %447 = vmatprep.subr.bf16.mxu1 %v446_v18 }
  0x7b   :  { %425 = vmatpush1.bf16.msra.mxu0 %v424_v17  ;;  %449 = vmatpush3.bf16.msra.mxu1 %v448_v23 }
  0x7c   :  { %451 = vmatprep.subr.bf16.mxu1 %v450_v25 }
  0x7e   :  { %196 = vmatmul.mubr.f32.vlgmr.msra.gmra.mrb[0].mxu0 %v85_v24 }
  0x7f   :  { %201 = vmatprep.mubr.f32.mxu0 %v618_v0  ;;  %453 = vmatpush3.bf16.msra.mxu1 %v452_v29  ;;  %v127_v0 = vsub.s32 1, %v122_v37 }
  0x80   :  { %455 = vmatprep.subr.bf16.mxu1 %v454_v32 }
  0x81   :  { %v128_v41 = vrot.slane %v119_v39, %v127_v0 }
  0x82   :  { %202 = vmatmul.mubr.f32.gmra.mrb[2].mxu0 %v86_v26 }
  0x83   :  { %457 = vmatpush3.bf16.msra.mxu1 %v456_v35 }
 0x151   :  { %v197_v42 = vpop.f32.mrb[0].mxu0 }
 0x152   :  { %v198_v43 = vadd.f32 %v197_v42, %v124_v40  ;;  %v199_v44 = vpop.f32.mrb[1].mxu0 }
 0x153   :  { %v200_v45 = vadd.f32 %v199_v44, %v128_v41 }
 0x154   :  { %v208_v48 = vmax.f32 %v198_v43, 0.0 }
 0x155   :  { %v203_v46 = vpop.f32.mrb[2].mxu0  ;;  %v209_v47 = vmax.f32 %v200_v45, 0.0 }
 0x156   :  { %v204_v49 = vadd.f32 %v203_v46, %v124_v40  ;;  %v205_v50 = vpop.f32.mrb[3].mxu0 }
 0x157   :  { %v206_v51 = vadd.f32 %v205_v50, %v128_v41  ;;  %323 = vmatprep.mubr.f32.mxu1 %v209_v47 }
 0x158   :  { %324 = vmatmul.mubr.f32.vlgmr.msra.gmra.mrb[0].mxu1 %v208_v48  ;;  %v210_v53 = vmax.f32 %v204_v49, 0.0 }
 0x159   :  { %v211_v52 = vmax.f32 %v206_v51, 0.0 }
 0x15b   :  { %328 = vmatprep.mubr.f32.mxu1 %v211_v52 }
 0x15c   :  { %329 = vmatmul.mubr.f32.gmra.mrb[2].mxu1 %v210_v53 }
 0x22b   :  { %v388_v54 = vpop.f32.mrb[0].mxu1 }
 0x22c   :  { %v389_v56 = vpop.f32.mrb[1].mxu1 }
 0x22d   :  { %v390_v57 = vadd.f32 %v389_v56, %v388_v54 }
 0x22f   :  { %v326_v58 = vadd.f32 %v390_v57, %v355_v55  ;;  %v391_v59 = vpop.f32.mrb[2].mxu1 }
 0x230   :  { %v392_v60 = vpop.f32.mrb[3].mxu1 }
 0x231   :  { %334 = vst [vmem:[#allocation12] sm:$0xff] %v326_v58  ;;  %v393_v61 = vadd.f32 %v392_v60, %v391_v59 }
 0x233   :  { %v331_v62 = vadd.f32 %v393_v61, %v355_v55 }
 0x235   :  { %335 = vst [vmem:[#allocation12 + $0x8] sm:$0xff] %v331_v62 }
 0x236   :  { %590 = shalt.err (!%p587_p2)
}
 0x237   :  { %s591_s8 = scalar_lea.hbm %s738_s5, 256 }
 0x238   :  { %p592_p3 = scmp.ne.s32.totalorder %s738_s5, %s591_s8  ;;  %p595_p4 = scmp.lt.u32.totalorder %s591_s8, %s738_s5 }
 0x23a   :  { %p597_p5 = pnand %p595_p4, %p592_p3 }
 0x23c   :  { %600 = shalt.err (!%p597_p5)
}
 0x23d   :  { %347 = dma.vmem_to_hbm [thread:$0]  %s342_s3, 256, %s738_s5, [#allocation5], %s614_s18, %s614_s18, %s615_s19  }
 0x23e   :  { %607 = dma.done.wait [#allocation5], 256  }
 0x23f   :  { %608 = vsyncadd [#allocation5], 4294967040 }
 0x240   :  { %351 = vsyncpa [#allocation4], 1 }
 0x241   :  { %352 = vsyncpa [#allocation7], 1 }
 0x242   :  { %353 = vsyncpa [#allocation10], 1 }
 0x243   :  { %354 = vsyncpa [#allocation5], 1 }

</bundles_post_ra>
